<compile_context>
chip_gen: v7x
topology: tpu7x:2x2x1
jax: 0.10.0
libtpu: 0.0.40
codegen_flags: <defaults>
</compile_context>

<pallas_src>
import bisect
import functools

import numpy as np

import jax
import jax.numpy as jnp
from jax.experimental import pallas as pl
from jax.experimental.pallas import tpu as pltpu


# identical tiled channels -> sum(frame * 0.33, dim=1) == (3 * 0.33) * frame
_SCALE = 3.0 * 0.33


# ----------------------------------------------------------------------------
# Host-side (trace-time) schedule simulation: mirrors `inference()` exactly but
# tracks each frame as endpoint weights instead of pixel data.
# ----------------------------------------------------------------------------
def _segment_weights(inter_frames):
    """Returns (inter_frames + 2, 2) weights over (start, end) in output order."""
    results = [np.array([1.0, 0.0]), np.array([0.0, 1.0])]
    idxes = [0, inter_frames + 1]
    remains = list(range(1, inter_frames + 1))
    splits = np.linspace(0.0, 1.0, inter_frames + 2)
    for _ in range(len(remains)):
        starts = splits[np.array(idxes[:-1])]
        ends = splits[np.array(idxes[1:])]
        distances = np.abs(
            (splits[None, np.array(remains)] - starts[:, None])
            / (ends[:, None] - starts[:, None])
            - 0.5
        )
        matrix = int(np.argmin(distances))
        start_i, step = np.unravel_index(matrix, distances.shape)
        end_i = start_i + 1
        dt = (splits[remains[step]] - splits[idxes[start_i]]) / (
            splits[idxes[end_i]] - splits[idxes[start_i]]
        )
        new_w = (1.0 - dt) * results[start_i] + dt * results[end_i]
        insert_position = bisect.bisect_left(idxes, remains[step])
        idxes.insert(insert_position, remains[step])
        results.insert(insert_position, new_w)
        del remains[step]
    return np.stack(results, axis=0)


def _build_weight_table():
    """(16, 3) weights over (y1, y2, y3) for the 16 output measurement frames."""
    seg1 = _segment_weights(5)          # 7 frames over (y1, y2)
    seg2 = _segment_weights(8)[1:]      # 10 frames over (y2, y3); first dropped
    w = np.zeros((seg1.shape[0] + seg2.shape[0], 3), dtype=np.float64)
    w[: seg1.shape[0], 0:2] = seg1
    w[seg1.shape[0]:, 1:3] = seg2
    return w


# ----------------------------------------------------------------------------
# Single fused Pallas kernel: all 16 frames + channel reduction in one pass.
# ----------------------------------------------------------------------------
def _fused_kernel(y_ref, o_ref, *, weights):
    """y_ref: (1, 3, HW) single-channel input frames (lane-dense).
    o_ref: (1, 16, HW) final measurement slab."""
    srcs = (y_ref[:, 0:1, :], y_ref[:, 1:2, :], y_ref[:, 2:3, :])
    for i, row in enumerate(weights):           # row: 3 Python floats (trace-time)
        acc = None
        for wt, src in zip(row, srcs):
            if wt == 0.0:
                continue
            term = src if wt == 1.0 else jnp.float32(wt) * src
            acc = term if acc is None else acc + term
        # Endpoint frames bypass the interpolator in the original code (no clamp);
        # interpolated frames are clamped to [0, 1].
        if not any(wt == 1.0 for wt in row):
            acc = jnp.clip(acc, 0.0, 1.0)
        o_ref[:, i:i + 1, :] = acc * jnp.float32(_SCALE)


# ----------------------------------------------------------------------------
# cnnModel.forward equivalent
# ----------------------------------------------------------------------------
def cnn_model_forward(y):
    """y: (B, >=3, H, W) float32 NCHW.  Returns (B, 16, H, W) float32."""
    y = y.astype(jnp.float32)
    B, _, H, W = y.shape
    HW = H * W                                  # 256 -> lane-dense (multiple of 128)
    y_flat = y[:, :3, :, :].reshape(B, 3, HW)

    weights = tuple(map(tuple, _build_weight_table().tolist()))
    n_frames = len(weights)                     # 16

    out = pl.pallas_call(
        functools.partial(_fused_kernel, weights=weights),
        out_shape=jax.ShapeDtypeStruct((B, n_frames, HW), jnp.float32),
        grid=(B,),
        in_specs=[pl.BlockSpec((1, 3, HW), lambda b: (b, 0, 0))],
        out_specs=pl.BlockSpec((1, n_frames, HW), lambda b: (b, 0, 0)),
        compiler_params=pltpu.CompilerParams(dimension_semantics=("parallel",)),
    )(y_flat)
    return out.reshape(B, n_frames, H, W)


# ----------------------------------------------------------------------------
# Pure-numpy reference replicating the ORIGINAL step-by-step dataflow
# (with the same blend proxy) for a correctness check.
# ----------------------------------------------------------------------------
def _reference_numpy(y):
    y = np.asarray(y, dtype=np.float32)

    def seg(x0, x1, inter_frames):
        results = [x0, x1]
        idxes = [0, inter_frames + 1]
        remains = list(range(1, inter_frames + 1))
        splits = np.linspace(0.0, 1.0, inter_frames + 2)
        for _ in range(len(remains)):
            starts = splits[np.array(idxes[:-1])]
            ends = splits[np.array(idxes[1:])]
            distances = np.abs(
                (splits[None, np.array(remains)] - starts[:, None])
                / (ends[:, None] - starts[:, None]) - 0.5)
            matrix = int(np.argmin(distances))
            start_i, step = np.unravel_index(matrix, distances.shape)
            end_i = start_i + 1
            dt = (splits[remains[step]] - splits[idxes[start_i]]) / (
                splits[idxes[end_i]] - splits[idxes[start_i]])
            pred = np.clip((1.0 - dt) * results[start_i] + dt * results[end_i],
                           0.0, 1.0)
            pos = bisect.bisect_left(idxes, remains[step])
            idxes.insert(pos, remains[step])
            results.insert(pos, pred)
            del remains[step]
        return results

    y1 = np.repeat(y[:, 0:1], 3, axis=1)
    y2 = np.repeat(y[:, 1:2], 3, axis=1)
    y3 = np.repeat(y[:, 2:3], 3, axis=1)
    de1 = seg(y1, y2, 5)
    de2 = seg(y2, y3, 8)
    m1 = np.stack([np.sum(f * 0.33, axis=1) for f in de1], axis=1)
    m2 = np.stack([np.sum(f * 0.33, axis=1) for f in de2], axis=1)[:, 1:]
    return np.concatenate([m1, m2], axis=1)


if __name__ == "__main__":
    key = jax.random.PRNGKey(0)
    B, H, W = 2, 16, 16
    y = jax.random.uniform(key, (B, 3, H, W), dtype=jnp.float32)

    out = jax.jit(cnn_model_forward)(y)
    out = jax.block_until_ready(out)

    assert out.shape == (B, 16, H, W), out.shape
    assert out.dtype == jnp.float32
    assert bool(jnp.all(jnp.isfinite(out)))

    ref = _reference_numpy(np.asarray(y))
    np.testing.assert_allclose(np.asarray(out), ref, rtol=1e-5, atol=1e-5)

    print("KERNEL_OK")
</pallas_src>

<mosaic_0001>
module attributes {stable_mosaic.version = 11 : i64} {
  func.func @_fused_kernel(%arg0: i32, %arg1: memref<1x3x256xf32, #tpu.memory_space<vmem>>, %arg2: memref<1x16x256xf32, #tpu.memory_space<vmem>>) attributes {dimension_semantics = [#tpu.dimension_semantics<parallel>], iteration_bounds = array<i64: 2>, scalar_prefetch = 0 : i64, scratch_operands = 0 : i64, tpu.core_type = #tpu.core_type<tc>, window_params = [{transform_indices = @transform_0, window_bounds = array<i64: 1, 3, 256>}, {transform_indices = @transform_1, window_bounds = array<i64: 1, 16, 256>}]} {
    %c0 = arith.constant 0 : index
    %c0_0 = arith.constant 0 : index
    %c0_1 = arith.constant 0 : index
    %0 = vector.load %arg1[%c0, %c0_0, %c0_1] : memref<1x3x256xf32, #tpu.memory_space<vmem>>, vector<1x1x256xf32>
    %c0_2 = arith.constant 0 : index
    %c1 = arith.constant 1 : index
    %c0_3 = arith.constant 0 : index
    %1 = vector.load %arg1[%c0_2, %c1, %c0_3] : memref<1x3x256xf32, #tpu.memory_space<vmem>>, vector<1x1x256xf32>
    %c0_4 = arith.constant 0 : index
    %c2 = arith.constant 2 : index
    %c0_5 = arith.constant 0 : index
    %2 = vector.load %arg1[%c0_4, %c2, %c0_5] : memref<1x3x256xf32, #tpu.memory_space<vmem>>, vector<1x1x256xf32>
    %cst = arith.constant 9.900000e-01 : f32
    %3 = vector.broadcast %cst : f32 to vector<1x1x256xf32>
    %4 = arith.mulf %0, %3 : vector<1x1x256xf32>
    %c0_6 = arith.constant 0 : index
    %c0_7 = arith.constant 0 : index
    %c0_8 = arith.constant 0 : index
    %5 = vector.load %arg2[%c0_6, %c0_7, %c0_8] : memref<1x16x256xf32, #tpu.memory_space<vmem>>, vector<1x1x256xf32>
    tpu.vector_store %arg2[%c0_6, %c0_7, %c0_8], %4 {strides = array<i32>} : memref<1x16x256xf32, #tpu.memory_space<vmem>>, vector<1x1x256xf32>,
    %cst_9 = arith.constant 0.833333313 : f32
    %6 = vector.broadcast %cst_9 : f32 to vector<1x1x256xf32>
    %7 = arith.mulf %6, %0 : vector<1x1x256xf32>
    %cst_10 = arith.constant 0.166666672 : f32
    %8 = vector.broadcast %cst_10 : f32 to vector<1x1x256xf32>
    %9 = arith.mulf %8, %1 : vector<1x1x256xf32>
    %10 = arith.addf %7, %9 : vector<1x1x256xf32>
    %cst_11 = arith.constant 0.000000e+00 : f32
    %cst_12 = arith.constant 1.000000e+00 : f32
    %11 = vector.broadcast %cst_11 : f32 to vector<1x1x256xf32>
    %12 = arith.maximumf %11, %10 : vector<1x1x256xf32>
    %13 = vector.broadcast %cst_12 : f32 to vector<1x1x256xf32>
    %14 = arith.minimumf %13, %12 : vector<1x1x256xf32>
    %cst_13 = arith.constant 9.900000e-01 : f32
    %15 = vector.broadcast %cst_13 : f32 to vector<1x1x256xf32>
    %16 = arith.mulf %14, %15 : vector<1x1x256xf32>
    %c0_14 = arith.constant 0 : index
    %c1_15 = arith.constant 1 : index
    %c0_16 = arith.constant 0 : index
    %17 = vector.load %arg2[%c0_14, %c1_15, %c0_16] : memref<1x16x256xf32, #tpu.memory_space<vmem>>, vector<1x1x256xf32>
    tpu.vector_store %arg2[%c0_14, %c1_15, %c0_16], %16 {strides = array<i32>} : memref<1x16x256xf32, #tpu.memory_space<vmem>>, vector<1x1x256xf32>,
    %cst_17 = arith.constant 0.666666686 : f32
    %18 = vector.broadcast %cst_17 : f32 to vector<1x1x256xf32>
    %19 = arith.mulf %18, %0 : vector<1x1x256xf32>
    %cst_18 = arith.constant 0.333333343 : f32
    %20 = vector.broadcast %cst_18 : f32 to vector<1x1x256xf32>
    %21 = arith.mulf %20, %1 : vector<1x1x256xf32>
    %22 = arith.addf %19, %21 : vector<1x1x256xf32>
    %cst_19 = arith.constant 0.000000e+00 : f32
    %cst_20 = arith.constant 1.000000e+00 : f32
    %23 = vector.broadcast %cst_19 : f32 to vector<1x1x256xf32>
    %24 = arith.maximumf %23, %22 : vector<1x1x256xf32>
    %25 = vector.broadcast %cst_20 : f32 to vector<1x1x256xf32>
    %26 = arith.minimumf %25, %24 : vector<1x1x256xf32>
    %cst_21 = arith.constant 9.900000e-01 : f32
    %27 = vector.broadcast %cst_21 : f32 to vector<1x1x256xf32>
    %28 = arith.mulf %26, %27 : vector<1x1x256xf32>
    %c0_22 = arith.constant 0 : index
    %c2_23 = arith.constant 2 : index
    %c0_24 = arith.constant 0 : index
    %29 = vector.load %arg2[%c0_22, %c2_23, %c0_24] : memref<1x16x256xf32, #tpu.memory_space<vmem>>, vector<1x1x256xf32>
    tpu.vector_store %arg2[%c0_22, %c2_23, %c0_24], %28 {strides = array<i32>} : memref<1x16x256xf32, #tpu.memory_space<vmem>>, vector<1x1x256xf32>,
    %cst_25 = arith.constant 5.000000e-01 : f32
    %30 = vector.broadcast %cst_25 : f32 to vector<1x1x256xf32>
    %31 = arith.mulf %30, %0 : vector<1x1x256xf32>
    %cst_26 = arith.constant 5.000000e-01 : f32
    %32 = vector.broadcast %cst_26 : f32 to vector<1x1x256xf32>
    %33 = arith.mulf %32, %1 : vector<1x1x256xf32>
    %34 = arith.addf %31, %33 : vector<1x1x256xf32>
    %cst_27 = arith.constant 0.000000e+00 : f32
    %cst_28 = arith.constant 1.000000e+00 : f32
    %35 = vector.broadcast %cst_27 : f32 to vector<1x1x256xf32>
    %36 = arith.maximumf %35, %34 : vector<1x1x256xf32>
    %37 = vector.broadcast %cst_28 : f32 to vector<1x1x256xf32>
    %38 = arith.minimumf %37, %36 : vector<1x1x256xf32>
    %cst_29 = arith.constant 9.900000e-01 : f32
    %39 = vector.broadcast %cst_29 : f32 to vector<1x1x256xf32>
    %40 = arith.mulf %38, %39 : vector<1x1x256xf32>
    %c0_30 = arith.constant 0 : index
    %c3 = arith.constant 3 : index
    %c0_31 = arith.constant 0 : index
    %41 = vector.load %arg2[%c0_30, %c3, %c0_31] : memref<1x16x256xf32, #tpu.memory_space<vmem>>, vector<1x1x256xf32>
    tpu.vector_store %arg2[%c0_30, %c3, %c0_31], %40 {strides = array<i32>} : memref<1x16x256xf32, #tpu.memory_space<vmem>>, vector<1x1x256xf32>,
    %cst_32 = arith.constant 0.333333343 : f32
    %42 = vector.broadcast %cst_32 : f32 to vector<1x1x256xf32>
    %43 = arith.mulf %42, %0 : vector<1x1x256xf32>
    %cst_33 = arith.constant 0.666666686 : f32
    %44 = vector.broadcast %cst_33 : f32 to vector<1x1x256xf32>
    %45 = arith.mulf %44, %1 : vector<1x1x256xf32>
    %46 = arith.addf %43, %45 : vector<1x1x256xf32>
    %cst_34 = arith.constant 0.000000e+00 : f32
    %cst_35 = arith.constant 1.000000e+00 : f32
    %47 = vector.broadcast %cst_34 : f32 to vector<1x1x256xf32>
    %48 = arith.maximumf %47, %46 : vector<1x1x256xf32>
    %49 = vector.broadcast %cst_35 : f32 to vector<1x1x256xf32>
    %50 = arith.minimumf %49, %48 : vector<1x1x256xf32>
    %cst_36 = arith.constant 9.900000e-01 : f32
    %51 = vector.broadcast %cst_36 : f32 to vector<1x1x256xf32>
    %52 = arith.mulf %50, %51 : vector<1x1x256xf32>
    %c0_37 = arith.constant 0 : index
    %c4 = arith.constant 4 : index
    %c0_38 = arith.constant 0 : index
    %53 = vector.load %arg2[%c0_37, %c4, %c0_38] : memref<1x16x256xf32, #tpu.memory_space<vmem>>, vector<1x1x256xf32>
    tpu.vector_store %arg2[%c0_37, %c4, %c0_38], %52 {strides = array<i32>} : memref<1x16x256xf32, #tpu.memory_space<vmem>>, vector<1x1x256xf32>,
    %cst_39 = arith.constant 0.166666672 : f32
    %54 = vector.broadcast %cst_39 : f32 to vector<1x1x256xf32>
    %55 = arith.mulf %54, %0 : vector<1x1x256xf32>
    %cst_40 = arith.constant 0.833333313 : f32
    %56 = vector.broadcast %cst_40 : f32 to vector<1x1x256xf32>
    %57 = arith.mulf %56, %1 : vector<1x1x256xf32>
    %58 = arith.addf %55, %57 : vector<1x1x256xf32>
    %cst_41 = arith.constant 0.000000e+00 : f32
    %cst_42 = arith.constant 1.000000e+00 : f32
    %59 = vector.broadcast %cst_41 : f32 to vector<1x1x256xf32>
    %60 = arith.maximumf %59, %58 : vector<1x1x256xf32>
    %61 = vector.broadcast %cst_42 : f32 to vector<1x1x256xf32>
    %62 = arith.minimumf %61, %60 : vector<1x1x256xf32>
    %cst_43 = arith.constant 9.900000e-01 : f32
    %63 = vector.broadcast %cst_43 : f32 to vector<1x1x256xf32>
    %64 = arith.mulf %62, %63 : vector<1x1x256xf32>
    %c0_44 = arith.constant 0 : index
    %c5 = arith.constant 5 : index
    %c0_45 = arith.constant 0 : index
    %65 = vector.load %arg2[%c0_44, %c5, %c0_45] : memref<1x16x256xf32, #tpu.memory_space<vmem>>, vector<1x1x256xf32>
    tpu.vector_store %arg2[%c0_44, %c5, %c0_45], %64 {strides = array<i32>} : memref<1x16x256xf32, #tpu.memory_space<vmem>>, vector<1x1x256xf32>,
    %cst_46 = arith.constant 9.900000e-01 : f32
    %66 = vector.broadcast %cst_46 : f32 to vector<1x1x256xf32>
    %67 = arith.mulf %1, %66 : vector<1x1x256xf32>
    %c0_47 = arith.constant 0 : index
    %c6 = arith.constant 6 : index
    %c0_48 = arith.constant 0 : index
    %68 = vector.load %arg2[%c0_47, %c6, %c0_48] : memref<1x16x256xf32, #tpu.memory_space<vmem>>, vector<1x1x256xf32>
    tpu.vector_store %arg2[%c0_47, %c6, %c0_48], %67 {strides = array<i32>} : memref<1x16x256xf32, #tpu.memory_space<vmem>>, vector<1x1x256xf32>,
    %cst_49 = arith.constant 0.888888895 : f32
    %69 = vector.broadcast %cst_49 : f32 to vector<1x1x256xf32>
    %70 = arith.mulf %69, %1 : vector<1x1x256xf32>
    %cst_50 = arith.constant 0.111111112 : f32
    %71 = vector.broadcast %cst_50 : f32 to vector<1x1x256xf32>
    %72 = arith.mulf %71, %2 : vector<1x1x256xf32>
    %73 = arith.addf %70, %72 : vector<1x1x256xf32>
    %cst_51 = arith.constant 0.000000e+00 : f32
    %cst_52 = arith.constant 1.000000e+00 : f32
    %74 = vector.broadcast %cst_51 : f32 to vector<1x1x256xf32>
    %75 = arith.maximumf %74, %73 : vector<1x1x256xf32>
    %76 = vector.broadcast %cst_52 : f32 to vector<1x1x256xf32>
    %77 = arith.minimumf %76, %75 : vector<1x1x256xf32>
    %cst_53 = arith.constant 9.900000e-01 : f32
    %78 = vector.broadcast %cst_53 : f32 to vector<1x1x256xf32>
    %79 = arith.mulf %77, %78 : vector<1x1x256xf32>
    %c0_54 = arith.constant 0 : index
    %c7 = arith.constant 7 : index
    %c0_55 = arith.constant 0 : index
    %80 = vector.load %arg2[%c0_54, %c7, %c0_55] : memref<1x16x256xf32, #tpu.memory_space<vmem>>, vector<1x1x256xf32>
    tpu.vector_store %arg2[%c0_54, %c7, %c0_55], %79 {strides = array<i32>} : memref<1x16x256xf32, #tpu.memory_space<vmem>>, vector<1x1x256xf32>,
    %cst_56 = arith.constant 0.777777791 : f32
    %81 = vector.broadcast %cst_56 : f32 to vector<1x1x256xf32>
    %82 = arith.mulf %81, %1 : vector<1x1x256xf32>
    %cst_57 = arith.constant 0.222222224 : f32
    %83 = vector.broadcast %cst_57 : f32 to vector<1x1x256xf32>
    %84 = arith.mulf %83, %2 : vector<1x1x256xf32>
    %85 = arith.addf %82, %84 : vector<1x1x256xf32>
    %cst_58 = arith.constant 0.000000e+00 : f32
    %cst_59 = arith.constant 1.000000e+00 : f32
    %86 = vector.broadcast %cst_58 : f32 to vector<1x1x256xf32>
    %87 = arith.maximumf %86, %85 : vector<1x1x256xf32>
    %88 = vector.broadcast %cst_59 : f32 to vector<1x1x256xf32>
    %89 = arith.minimumf %88, %87 : vector<1x1x256xf32>
    %cst_60 = arith.constant 9.900000e-01 : f32
    %90 = vector.broadcast %cst_60 : f32 to vector<1x1x256xf32>
    %91 = arith.mulf %89, %90 : vector<1x1x256xf32>
    %c0_61 = arith.constant 0 : index
    %c8 = arith.constant 8 : index
    %c0_62 = arith.constant 0 : index
    %92 = vector.load %arg2[%c0_61, %c8, %c0_62] : memref<1x16x256xf32, #tpu.memory_space<vmem>>, vector<1x1x256xf32>
    tpu.vector_store %arg2[%c0_61, %c8, %c0_62], %91 {strides = array<i32>} : memref<1x16x256xf32, #tpu.memory_space<vmem>>, vector<1x1x256xf32>,
    %cst_63 = arith.constant 0.666666686 : f32
    %93 = vector.broadcast %cst_63 : f32 to vector<1x1x256xf32>
    %94 = arith.mulf %93, %1 : vector<1x1x256xf32>
    %cst_64 = arith.constant 0.333333343 : f32
    %95 = vector.broadcast %cst_64 : f32 to vector<1x1x256xf32>
    %96 = arith.mulf %95, %2 : vector<1x1x256xf32>
    %97 = arith.addf %94, %96 : vector<1x1x256xf32>
    %cst_65 = arith.constant 0.000000e+00 : f32
    %cst_66 = arith.constant 1.000000e+00 : f32
    %98 = vector.broadcast %cst_65 : f32 to vector<1x1x256xf32>
    %99 = arith.maximumf %98, %97 : vector<1x1x256xf32>
    %100 = vector.broadcast %cst_66 : f32 to vector<1x1x256xf32>
    %101 = arith.minimumf %100, %99 : vector<1x1x256xf32>
    %cst_67 = arith.constant 9.900000e-01 : f32
    %102 = vector.broadcast %cst_67 : f32 to vector<1x1x256xf32>
    %103 = arith.mulf %101, %102 : vector<1x1x256xf32>
    %c0_68 = arith.constant 0 : index
    %c9 = arith.constant 9 : index
    %c0_69 = arith.constant 0 : index
    %104 = vector.load %arg2[%c0_68, %c9, %c0_69] : memref<1x16x256xf32, #tpu.memory_space<vmem>>, vector<1x1x256xf32>
    tpu.vector_store %arg2[%c0_68, %c9, %c0_69], %103 {strides = array<i32>} : memref<1x16x256xf32, #tpu.memory_space<vmem>>, vector<1x1x256xf32>,
    %cst_70 = arith.constant 0.555555582 : f32
    %105 = vector.broadcast %cst_70 : f32 to vector<1x1x256xf32>
    %106 = arith.mulf %105, %1 : vector<1x1x256xf32>
    %cst_71 = arith.constant 0.444444448 : f32
    %107 = vector.broadcast %cst_71 : f32 to vector<1x1x256xf32>
    %108 = arith.mulf %107, %2 : vector<1x1x256xf32>
    %109 = arith.addf %106, %108 : vector<1x1x256xf32>
    %cst_72 = arith.constant 0.000000e+00 : f32
    %cst_73 = arith.constant 1.000000e+00 : f32
    %110 = vector.broadcast %cst_72 : f32 to vector<1x1x256xf32>
    %111 = arith.maximumf %110, %109 : vector<1x1x256xf32>
    %112 = vector.broadcast %cst_73 : f32 to vector<1x1x256xf32>
    %113 = arith.minimumf %112, %111 : vector<1x1x256xf32>
    %cst_74 = arith.constant 9.900000e-01 : f32
    %114 = vector.broadcast %cst_74 : f32 to vector<1x1x256xf32>
    %115 = arith.mulf %113, %114 : vector<1x1x256xf32>
    %c0_75 = arith.constant 0 : index
    %c10 = arith.constant 10 : index
    %c0_76 = arith.constant 0 : index
    %116 = vector.load %arg2[%c0_75, %c10, %c0_76] : memref<1x16x256xf32, #tpu.memory_space<vmem>>, vector<1x1x256xf32>
    tpu.vector_store %arg2[%c0_75, %c10, %c0_76], %115 {strides = array<i32>} : memref<1x16x256xf32, #tpu.memory_space<vmem>>, vector<1x1x256xf32>,
    %cst_77 = arith.constant 0.444444448 : f32
    %117 = vector.broadcast %cst_77 : f32 to vector<1x1x256xf32>
    %118 = arith.mulf %117, %1 : vector<1x1x256xf32>
    %cst_78 = arith.constant 0.555555582 : f32
    %119 = vector.broadcast %cst_78 : f32 to vector<1x1x256xf32>
    %120 = arith.mulf %119, %2 : vector<1x1x256xf32>
    %121 = arith.addf %118, %120 : vector<1x1x256xf32>
    %cst_79 = arith.constant 0.000000e+00 : f32
    %cst_80 = arith.constant 1.000000e+00 : f32
    %122 = vector.broadcast %cst_79 : f32 to vector<1x1x256xf32>
    %123 = arith.maximumf %122, %121 : vector<1x1x256xf32>
    %124 = vector.broadcast %cst_80 : f32 to vector<1x1x256xf32>
    %125 = arith.minimumf %124, %123 : vector<1x1x256xf32>
    %cst_81 = arith.constant 9.900000e-01 : f32
    %126 = vector.broadcast %cst_81 : f32 to vector<1x1x256xf32>
    %127 = arith.mulf %125, %126 : vector<1x1x256xf32>
    %c0_82 = arith.constant 0 : index
    %c11 = arith.constant 11 : index
    %c0_83 = arith.constant 0 : index
    %128 = vector.load %arg2[%c0_82, %c11, %c0_83] : memref<1x16x256xf32, #tpu.memory_space<vmem>>, vector<1x1x256xf32>
    tpu.vector_store %arg2[%c0_82, %c11, %c0_83], %127 {strides = array<i32>} : memref<1x16x256xf32, #tpu.memory_space<vmem>>, vector<1x1x256xf32>,
    %cst_84 = arith.constant 0.333333343 : f32
    %129 = vector.broadcast %cst_84 : f32 to vector<1x1x256xf32>
    %130 = arith.mulf %129, %1 : vector<1x1x256xf32>
    %cst_85 = arith.constant 0.666666686 : f32
    %131 = vector.broadcast %cst_85 : f32 to vector<1x1x256xf32>
    %132 = arith.mulf %131, %2 : vector<1x1x256xf32>
    %133 = arith.addf %130, %132 : vector<1x1x256xf32>
    %cst_86 = arith.constant 0.000000e+00 : f32
    %cst_87 = arith.constant 1.000000e+00 : f32
    %134 = vector.broadcast %cst_86 : f32 to vector<1x1x256xf32>
    %135 = arith.maximumf %134, %133 : vector<1x1x256xf32>
    %136 = vector.broadcast %cst_87 : f32 to vector<1x1x256xf32>
    %137 = arith.minimumf %136, %135 : vector<1x1x256xf32>
    %cst_88 = arith.constant 9.900000e-01 : f32
    %138 = vector.broadcast %cst_88 : f32 to vector<1x1x256xf32>
    %139 = arith.mulf %137, %138 : vector<1x1x256xf32>
    %c0_89 = arith.constant 0 : index
    %c12 = arith.constant 12 : index
    %c0_90 = arith.constant 0 : index
    %140 = vector.load %arg2[%c0_89, %c12, %c0_90] : memref<1x16x256xf32, #tpu.memory_space<vmem>>, vector<1x1x256xf32>
    tpu.vector_store %arg2[%c0_89, %c12, %c0_90], %139 {strides = array<i32>} : memref<1x16x256xf32, #tpu.memory_space<vmem>>, vector<1x1x256xf32>,
    %cst_91 = arith.constant 0.222222224 : f32
    %141 = vector.broadcast %cst_91 : f32 to vector<1x1x256xf32>
    %142 = arith.mulf %141, %1 : vector<1x1x256xf32>
    %cst_92 = arith.constant 0.777777791 : f32
    %143 = vector.broadcast %cst_92 : f32 to vector<1x1x256xf32>
    %144 = arith.mulf %143, %2 : vector<1x1x256xf32>
    %145 = arith.addf %142, %144 : vector<1x1x256xf32>
    %cst_93 = arith.constant 0.000000e+00 : f32
    %cst_94 = arith.constant 1.000000e+00 : f32
    %146 = vector.broadcast %cst_93 : f32 to vector<1x1x256xf32>
    %147 = arith.maximumf %146, %145 : vector<1x1x256xf32>
    %148 = vector.broadcast %cst_94 : f32 to vector<1x1x256xf32>
    %149 = arith.minimumf %148, %147 : vector<1x1x256xf32>
    %cst_95 = arith.constant 9.900000e-01 : f32
    %150 = vector.broadcast %cst_95 : f32 to vector<1x1x256xf32>
    %151 = arith.mulf %149, %150 : vector<1x1x256xf32>
    %c0_96 = arith.constant 0 : index
    %c13 = arith.constant 13 : index
    %c0_97 = arith.constant 0 : index
    %152 = vector.load %arg2[%c0_96, %c13, %c0_97] : memref<1x16x256xf32, #tpu.memory_space<vmem>>, vector<1x1x256xf32>
    tpu.vector_store %arg2[%c0_96, %c13, %c0_97], %151 {strides = array<i32>} : memref<1x16x256xf32, #tpu.memory_space<vmem>>, vector<1x1x256xf32>,
    %cst_98 = arith.constant 0.111111112 : f32
    %153 = vector.broadcast %cst_98 : f32 to vector<1x1x256xf32>
    %154 = arith.mulf %153, %1 : vector<1x1x256xf32>
    %cst_99 = arith.constant 0.888888895 : f32
    %155 = vector.broadcast %cst_99 : f32 to vector<1x1x256xf32>
    %156 = arith.mulf %155, %2 : vector<1x1x256xf32>
    %157 = arith.addf %154, %156 : vector<1x1x256xf32>
    %cst_100 = arith.constant 0.000000e+00 : f32
    %cst_101 = arith.constant 1.000000e+00 : f32
    %158 = vector.broadcast %cst_100 : f32 to vector<1x1x256xf32>
    %159 = arith.maximumf %158, %157 : vector<1x1x256xf32>
    %160 = vector.broadcast %cst_101 : f32 to vector<1x1x256xf32>
    %161 = arith.minimumf %160, %159 : vector<1x1x256xf32>
    %cst_102 = arith.constant 9.900000e-01 : f32
    %162 = vector.broadcast %cst_102 : f32 to vector<1x1x256xf32>
    %163 = arith.mulf %161, %162 : vector<1x1x256xf32>
    %c0_103 = arith.constant 0 : index
    %c14 = arith.constant 14 : index
    %c0_104 = arith.constant 0 : index
    %164 = vector.load %arg2[%c0_103, %c14, %c0_104] : memref<1x16x256xf32, #tpu.memory_space<vmem>>, vector<1x1x256xf32>
    tpu.vector_store %arg2[%c0_103, %c14, %c0_104], %163 {strides = array<i32>} : memref<1x16x256xf32, #tpu.memory_space<vmem>>, vector<1x1x256xf32>,
    %cst_105 = arith.constant 9.900000e-01 : f32
    %165 = vector.broadcast %cst_105 : f32 to vector<1x1x256xf32>
    %166 = arith.mulf %2, %165 : vector<1x1x256xf32>
    %c0_106 = arith.constant 0 : index
    %c15 = arith.constant 15 : index
    %c0_107 = arith.constant 0 : index
    %167 = vector.load %arg2[%c0_106, %c15, %c0_107] : memref<1x16x256xf32, #tpu.memory_space<vmem>>, vector<1x1x256xf32>
    tpu.vector_store %arg2[%c0_106, %c15, %c0_107], %166 {strides = array<i32>} : memref<1x16x256xf32, #tpu.memory_space<vmem>>, vector<1x1x256xf32>,
    return
  }
  func.func @transform_0(%arg0: i32) -> (i32, i32, i32) {
    %c0_i32 = arith.constant 0 : i32
    %c0_i32_0 = arith.constant 0 : i32
    %c0_i32_1 = arith.constant 0 : i32
    return %arg0, %c0_i32, %c0_i32_0 : i32, i32, i32
  }
  func.func @transform_1(%arg0: i32) -> (i32, i32, i32) {
    %c0_i32 = arith.constant 0 : i32
    %c0_i32_0 = arith.constant 0 : i32
    %c0_i32_1 = arith.constant 0 : i32
    return %arg0, %c0_i32, %c0_i32_0 : i32, i32, i32
  }
}

</mosaic_0001>

<bundles_post_ra>
// kernel: cnn_model_forward.1
= control target key start
LH: loop header
LB: loop body
LE: loop exit
PB: predicated region body
PF: predicated region fallthrough
CT: control target
= control target key end

     0   :  { %s363_s6 = smov 0   ;;  %s463_s0 = inlined_call_operand.vmem [shape: f32[2,3,256], index: 0, kind: input, shape index: {}]   ;;  %s464_s1 = inlined_call_operand.vmem [shape: f32[2,16,256], index: 1, kind: output, shape index: {}]  }
   0x1 LB: > { %s307_s7 = sadd.s32 4294967295, %s351_s6   ;;  %p311_p0 = scmp.ge.s32.totalorder %s351_s6, 1  ;;  %s351_s6 = sphi %s363_s6, %s11_s6  }
   0x2   : > { %p87_p1 = scmp.lt.s32.totalorder %s351_s6, 3 }
   0x4   : > { %p88_p2 = pnand %p311_p0, %p87_p1 }
   0x5   : > { %p107_p3 = scmp.lt.s32.totalorder (!%p88_p2), %s307_s7, 1  ;;  %v123_v0 = vlaneseq (!%p88_p2) }
   0x6   : > { %91 = sbr.rel (%p88_p2) target bundleno = 48 (0x30), region = 24 }
   0x7   : > { %vm374_vm0 = vcmp.lt.s32.totalorder (!%p88_p2), %v123_v0, 256 }
   0xd   : > { %s468_s7 = smov (!%p107_p3, %s307_s7), 1 }
   0xe   : > { %s335_s8 = sshll.u32 %s468_s7, 3  ;;  %s336_s9 = sshll.u32 %s468_s7, 5 }
   0xf   : > { %s111_s12 = scalar_lea.vmem %s463_s0, %s335_s8  ;;  %s381_s15 = scalar_lea.vmem %s464_s1, %s336_s9 }
  0x10   : > { %v117_v2 = vld [vmem:[%s111_s12] ss:$4 sm:$0x3]  ;;  %v383_v3 = vld [vmem:[%s111_s12 + $0x1] ss:$4 sm:$0x3] }
  0x11   : > { %v385_v4 = vld [vmem:[%s111_s12 + $0x2] ss:$4 sm:$0x3]  ;;  %v122_v5 = vmul.f32 0.99, %v117_v2  ;;  %v147_v6 = vmul.f32 0.5, %v117_v2 }
  0x12   : > { %v129_v7 = vmul.f32 0.8333333, %v117_v2  ;;  %v130_v8 = vmul.f32 0.16666667, %v383_v3  ;;  %v138_v9 = vmul.f32 0.6666667, %v117_v2 }
  0x13   : > { %127 = vst.msk [vmem:[%s381_s15] ss:$8 sm:$0x3] %vm374_vm0, %v122_v5  ;;  %v392_v10 = vmul.f32 0.33333334, %v383_v3  ;;  %v148_v11 = vmul.f32 0.5, %v383_v3 }
  0x14   : > { %v156_v12 = vmul.f32 0.33333334, %v117_v2  ;;  %v131_v13 = vadd.f32 %v130_v8, %v129_v7  ;;  %v157_v14 = vmul.f32 0.6666667, %v383_v3  ;;  %v165_v15 = vmul.f32 0.16666667, %v117_v2 }
  0x15   : > { %v166_v16 = vmul.f32 0.8333333, %v383_v3  ;;  %v140_v17 = vadd.f32 %v392_v10, %v138_v9  ;;  %v149_v18 = vadd.f32 %v148_v11, %v147_v6  ;;  %v174_v19 = vmul.f32 0.99, %v383_v3 }
  0x16   : > { %v178_v20 = vmul.f32 0.8888889, %v383_v3  ;;  %v132_v21 = vmax.f32 %v131_v13, 0.0  ;;  %v158_v22 = vadd.f32 %v157_v14, %v156_v12  ;;  %v179_v24 = vmul.f32 0.11111111, %v385_v4 }
  0x17   : > { %v167_v23 = vadd.f32 %v166_v16, %v165_v15  ;;  %v141_v25 = vmax.f32 %v140_v17, 0.0  ;;  %v150_v26 = vmax.f32 %v149_v18, 0.0  ;;  %323 = vst.msk [vmem:[%s381_s15 + $0x6] ss:$8 sm:$0x3] %vm374_vm0, %v174_v19 }
  0x18   : > { %v187_v27 = vmul.f32 0.7777778, %v383_v3  ;;  %v188_v28 = vmul.f32 0.22222222, %v385_v4  ;;  %v133_v29 = vmin.f32 %v132_v21, 1.0  ;;  %v159_v30 = vmax.f32 %v158_v22, 0.0 }
  0x19   : > { %v168_v31 = vmax.f32 %v167_v23, 0.0  ;;  %v180_v32 = vadd.f32 %v179_v24, %v178_v20  ;;  %v142_v33 = vmin.f32 %v141_v25, 1.0  ;;  %v151_v34 = vmin.f32 %v150_v26, 1.0 }
  0x1a   : > { %v189_v35 = vadd.f32 %v188_v28, %v187_v27  ;;  %v196_v36 = vmul.f32 0.33333334, %v385_v4  ;;  %v134_v37 = vmul.f32 0.99, %v133_v29  ;;  %v160_v38 = vmin.f32 %v159_v30, 1.0 }
  0x1b   : > { %v169_v39 = vmin.f32 %v168_v31, 1.0  ;;  %v181_v40 = vmax.f32 %v180_v32, 0.0  ;;  %v143_v41 = vmul.f32 0.99, %v142_v33  ;;  %v152_v42 = vmul.f32 0.99, %v151_v34 }
  0x1c   : > { %v190_v43 = vmax.f32 %v189_v35, 0.0  ;;  %v197_v44 = vadd.f32 %v196_v36, %v157_v14  ;;  %318 = vst.msk [vmem:[%s381_s15 + $0x1] ss:$8 sm:$0x3] %vm374_vm0, %v134_v37  ;;  %v161_v45 = vmul.f32 0.99, %v160_v38 }
  0x1d   : > { %v170_v46 = vmul.f32 0.99, %v169_v39  ;;  %v182_v47 = vmin.f32 %v181_v40, 1.0  ;;  %319 = vst.msk [vmem:[%s381_s15 + $0x2] ss:$8 sm:$0x3] %vm374_vm0, %v143_v41 }
  0x1e   : > { %320 = vst.msk [vmem:[%s381_s15 + $0x3] ss:$8 sm:$0x3] %vm374_vm0, %v152_v42  ;;  %v191_v48 = vmin.f32 %v190_v43, 1.0  ;;  %v198_v49 = vmax.f32 %v197_v44, 0.0 }
  0x1f   : > { %v204_v50 = vmul.f32 0.5555556, %v383_v3  ;;  %v205_v51 = vmul.f32 0.44444445, %v385_v4  ;;  %v183_v52 = vmul.f32 0.99, %v182_v47 }
  0x20   : > { %321 = vst.msk [vmem:[%s381_s15 + $0x4] ss:$8 sm:$0x3] %vm374_vm0, %v161_v45  ;;  %322 = vst.msk [vmem:[%s381_s15 + $0x5] ss:$8 sm:$0x3] %vm374_vm0, %v170_v46 }
  0x21   : > { %v213_v53 = vmul.f32 0.44444445, %v383_v3  ;;  %v214_v54 = vmul.f32 0.5555556, %v385_v4  ;;  %v192_v55 = vmul.f32 0.99, %v191_v48  ;;  %v206_v57 = vadd.f32 %v205_v51, %v204_v50 }
  0x22   : > { %v199_v56 = vmin.f32 %v198_v49, 1.0  ;;  %v222_v58 = vmul.f32 0.6666667, %v385_v4  ;;  %324 = vst.msk [vmem:[%s381_s15 + $0x7] ss:$8 sm:$0x3] %vm374_vm0, %v183_v52 }
  0x23   : > { %v215_v59 = vadd.f32 %v214_v54, %v213_v53  ;;  %v230_v60 = vmul.f32 0.22222222, %v383_v3  ;;  %v231_v61 = vmul.f32 0.7777778, %v385_v4  ;;  %v239_v62 = vmul.f32 0.11111111, %v383_v3 }
  0x24   : > { %325 = vst.msk [vmem:[%s381_s15 + $0x10] ss:$8 sm:$0x3] %vm374_vm0, %v192_v55  ;;  %v200_v63 = vmul.f32 0.99, %v199_v56  ;;  %v207_v0 = vmax.f32 %v206_v57, 0.0  ;;  %v223_v2 = vadd.f32 %v222_v58, %v392_v10 }
  0x25   : > { %v240_v5 = vmul.f32 0.8888889, %v385_v4  ;;  %v216_v6 = vmax.f32 %v215_v59, 0.0  ;;  %v232_v7 = vadd.f32 %v231_v61, %v230_v60  ;;  %v248_v8 = vmul.f32 0.99, %v385_v4 }
  0x26   : > { %326 = vst.msk [vmem:[%s381_s15 + $0x11] ss:$8 sm:$0x3] %vm374_vm0, %v200_v63  ;;  %v208_v9 = vmin.f32 %v207_v0, 1.0  ;;  %v224_v3 = vmax.f32 %v223_v2, 0.0 }
  0x27   : > { %v241_v11 = vadd.f32 %v240_v5, %v239_v62  ;;  %v217_v12 = vmin.f32 %v216_v6, 1.0  ;;  %v233_v13 = vmax.f32 %v232_v7, 0.0  ;;  %332 = vst.msk [vmem:[%s381_s15 + $0x17] ss:$8 sm:$0x3] %vm374_vm0, %v248_v8 }
  0x28   : > { %v209_v10 = vmul.f32 0.99, %v208_v9  ;;  %v225_v14 = vmin.f32 %v224_v3, 1.0 }
  0x29   : > { %v242_v15 = vmax.f32 %v241_v11, 0.0  ;;  %v218_v16 = vmul.f32 0.99, %v217_v12  ;;  %v234_v4 = vmin.f32 %v233_v13, 1.0 }
  0x2a   : > { %327 = vst.msk [vmem:[%s381_s15 + $0x12] ss:$8 sm:$0x3] %vm374_vm0, %v209_v10  ;;  %v226_v17 = vmul.f32 0.99, %v225_v14 }
  0x2b   : > { %v243_v18 = vmin.f32 %v242_v15, 1.0  ;;  %328 = vst.msk [vmem:[%s381_s15 + $0x13] ss:$8 sm:$0x3] %vm374_vm0, %v218_v16  ;;  %v235_v19 = vmul.f32 0.99, %v234_v4 }
  0x2c   : > { %329 = vst.msk [vmem:[%s381_s15 + $0x14] ss:$8 sm:$0x3] %vm374_vm0, %v226_v17 }
  0x2d   : > { %v244_v20 = vmul.f32 0.99, %v243_v18  ;;  %330 = vst.msk [vmem:[%s381_s15 + $0x15] ss:$8 sm:$0x3] %vm374_vm0, %v235_v19 }
  0x2f   : > { %331 = vst.msk [vmem:[%s381_s15 + $0x16] ss:$8 sm:$0x3] %vm374_vm0, %v244_v20 }
  0x30 PF: > { %s11_s6 = sadd.s32 1, %s351_s6  }
  0x31   : > { %p8_p4 = scmp.ge.s32.totalorder %s11_s6, 4  }
  0x33   :  { %10 = sbr.rel (!%p8_p4) target bundleno = 1 (0x1), region = 71 }

</bundles_post_ra>
